<compile_context>
chip_gen: v7x
topology: tpu7x:2x2x1
jax: 0.10.0
libtpu: 0.0.40
codegen_flags: <defaults>
</compile_context>

<pallas_src>
import jax
import jax.numpy as jnp
from jax import lax
from jax.experimental import pallas as pl
from jax.experimental.pallas import tpu as pltpu


def _log_sigmoid(x):
    # Numerically stable logsigmoid(x) = min(x, 0) - log(1 + exp(-|x|)).
    # exp/log run on the EUP slot, which is otherwise idle in this kernel.
    # (log vs log1p differs only when exp(-|x|) is tiny, where the term is ~0 anyway —
    #  well inside the test tolerance for f32.)
    return jnp.minimum(x, 0.0) - jnp.log(1.0 + jnp.exp(-jnp.abs(x)))


def skipgram_forward(input_weight, output_weight, pos_input, pos_output, neg_v):
    """SkipGram forward: fused one-hot embedding gathers + loss math in one Pallas kernel."""
    vocab, dim = input_weight.shape
    batch = pos_input.shape[0]
    k_neg = neg_v.shape[1]
    n_neg = batch * k_neg
    # torch.matmul((B, D), (B, D)) in the reference is only defined when B == D.
    assert batch == dim, "reference semantics require batch == embed_dim"

    # Full-table VMEM residency + dense one-hot gathers only make sense for small vocabs.
    # TODO(synk): for large vocabularies, keep the tables in HBM (memory_space=pl.ANY) and
    # gather rows with double-buffered pltpu.make_async_copy DMAs instead of one-hot matmuls.
    footprint = 4 * (2 * vocab * dim + vocab * n_neg + batch * vocab)
    assert footprint <= 8 * 1024 * 1024, "vocab too large for VMEM-resident one-hot gather"

    # ---- batch-global, tile-invariant work hoisted out of the kernel (review opt 2) ----
    # Positive-score factorization: sum_j (E_in @ E_out)[i, j] == dot(E_in[i, :], rowsum(E_out)),
    # so only the (1, B) vector of per-row sums of the gathered context embeddings is needed.
    s_row = jnp.sum(jnp.take(output_weight, pos_output, axis=0), axis=1)
    s_row = s_row.reshape(1, batch).astype(jnp.float32)              # (1, B) == (1, D)

    # Per-example grouping band for the negatives: band[b, r] = 1 iff flat negative row r
    # (r = b*K + k) belongs to example b.  Hoisted constant (review opt 3), DMA'd once.
    band = (jnp.arange(n_neg, dtype=jnp.int32)[None, :] // k_neg
            == jnp.arange(batch, dtype=jnp.int32)[:, None]).astype(jnp.float32)  # (B, B*K)

    # Index vectors as 2-D int32 VMEM inputs so the kernel can build one-hot matrices.
    in_idx = pos_input.astype(jnp.int32).reshape(batch, 1)           # (B, 1)
    neg_idx = neg_v.astype(jnp.int32).reshape(1, n_neg)              # (1, B*K) row vector
    # Output table passed transposed so the negative gather / score chain is all plain
    # "A @ B" MXU matmuls with no in-kernel transposes (wrapper-side layout plumbing).
    w_in = input_weight.astype(jnp.float32)                          # (V, D)
    w_out_t = output_weight.T.astype(jnp.float32)                    # (D, V)

    def kernel(in_idx_ref, neg_idx_ref, s_row_ref, band_ref, w_in_ref, w_out_t_ref,
               loss_ref):
        # ---- vectorized one-hot gathers on the MXU (replaces unrolled row copies) ----
        oh_in = jnp.where(
            lax.broadcasted_iota(jnp.int32, (batch, vocab), 1) == in_idx_ref[...],
            1.0, 0.0).astype(jnp.float32)                                      # (B, V)
        emb_in = jnp.dot(oh_in, w_in_ref[...],
                         preferred_element_type=jnp.float32)                   # (B, D)
        oh_neg_t = jnp.where(
            lax.broadcasted_iota(jnp.int32, (vocab, n_neg), 0) == neg_idx_ref[...],
            1.0, 0.0).astype(jnp.float32)                                      # (V, B*K)
        emb_neg_t = jnp.dot(w_out_t_ref[...], oh_neg_t,
                            preferred_element_type=jnp.float32)                # (D, B*K)

        # ---- positive term (factored; whole-batch rowsum hoisted into s_row) ----
        score = jnp.sum(emb_in * s_row_ref[...], axis=1, keepdims=True)        # (B, 1)
        pos_loss = -_log_sigmoid(score)                                        # (B, 1)

        # ---- negative term: lane-dense pairwise scores + banded group reduce ----
        neg_all = jnp.dot(emb_in, emb_neg_t,
                          preferred_element_type=jnp.float32)                  # (B, B*K)
        neg_all = jnp.clip(neg_all, -10.0, 10.0)
        lsg = _log_sigmoid(-neg_all)            # finite everywhere thanks to the clamp
        grp = jnp.sum(band_ref[...] * lsg, axis=1, keepdims=True)              # (B, 1)
        # reference: ns2 = -sum_k logsig(-ns); neg_loss = -logsig(-ns2) = -logsig(grp)
        neg_loss = -_log_sigmoid(grp)                                          # (B, 1)

        # Final mean folded into the kernel: a single (1, 1) store, no per-tile partials.
        loss_ref[...] = (jnp.sum(pos_loss + neg_loss, axis=0, keepdims=True)
                         * (1.0 / batch))

    cost = pl.CostEstimate(
        flops=(2 * vocab * dim * (batch + n_neg)       # one-hot gather matmuls
               + 2 * batch * dim * n_neg               # pairwise negative scores
               + 2 * batch * (dim + n_neg)),           # factored score + band reduce
        transcendentals=2 * (batch * n_neg + 2 * batch),
        bytes_accessed=4 * (2 * vocab * dim + batch * n_neg + 2 * batch + n_neg + dim + 1),
    )

    # TODO(synk): for large batches, reinstate a batch-tiled grid with
    # dimension_semantics=("parallel",) (2 tiles on v7x) over the B axis of in_idx /
    # neg_idx / band; for this problem size a single step is fastest on all chips.
    out = pl.pallas_call(
        kernel,
        out_shape=jax.ShapeDtypeStruct((1, 1), jnp.float32),
        grid=(1,),
        in_specs=[
            pl.BlockSpec((batch, 1), lambda i: (0, 0)),        # pos_input indices
            pl.BlockSpec((1, n_neg), lambda i: (0, 0)),        # neg_v indices (flat row)
            pl.BlockSpec((1, batch), lambda i: (0, 0)),        # hoisted rowsum(E_out)
            pl.BlockSpec((batch, n_neg), lambda i: (0, 0)),    # hoisted grouping band
            pl.BlockSpec((vocab, dim), lambda i: (0, 0)),      # input_weight
            pl.BlockSpec((dim, vocab), lambda i: (0, 0)),      # output_weight^T
        ],
        out_specs=pl.BlockSpec((1, 1), lambda i: (0, 0)),
        compiler_params=pltpu.CompilerParams(
            dimension_semantics=("arbitrary",),
            vmem_limit_bytes=32 * 1024 * 1024,   # actual usage is ~100 KB; safe everywhere
        ),
        cost_estimate=cost,
    )(in_idx, neg_idx, s_row, band, w_in, w_out_t)

    return out[0, 0]


def skipgram_forward_ref(input_weight, output_weight, pos_input, pos_output, neg_v):
    """Pure-JAX reference for correctness checking (mirrors the PyTorch module)."""
    emb_in = jnp.take(input_weight, pos_input, axis=0)
    emb_out = jnp.take(output_weight, pos_output, axis=0)
    emb_neg = jnp.take(output_weight, neg_v, axis=0)
    score = jnp.sum(emb_in @ emb_out, axis=1, keepdims=True)
    pos_loss = -jax.nn.log_sigmoid(score)
    neg_score = jnp.einsum("bkd,bd->bk", emb_neg, emb_in)
    neg_score = jnp.clip(neg_score, -10.0, 10.0)
    neg_score = -jnp.sum(jax.nn.log_sigmoid(-neg_score), axis=1, keepdims=True)
    neg_loss = -jnp.sum(jax.nn.log_sigmoid(-neg_score), axis=1, keepdims=True)
    return jnp.mean(pos_loss + neg_loss)


if __name__ == "__main__":
    vocab_size = 64
    embed_dim = 32
    B = embed_dim   # torch.matmul((B,D),(B,D)) requires B == D
    K = 8           # negative samples per example

    key = jax.random.PRNGKey(0)
    k1, k2, k3, k4, k5 = jax.random.split(key, 5)

    init_range = 1.0 / embed_dim
    input_weight = jax.random.uniform(
        k1, (vocab_size, embed_dim), jnp.float32, -init_range, init_range)
    # The module inits output_weight to 0 (init.constant), which makes the forward
    # degenerate (all-zero scores); use the same small-uniform init here so the
    # kernel's gather / reduce / logsigmoid path is numerically exercised.
    output_weight = jax.random.uniform(
        k2, (vocab_size, embed_dim), jnp.float32, -init_range, init_range)

    pos_input = jax.random.randint(k3, (B,), 0, vocab_size, dtype=jnp.int32)
    pos_output = jax.random.randint(k4, (B,), 0, vocab_size, dtype=jnp.int32)
    neg_v = jax.random.randint(k5, (B, K), 0, vocab_size, dtype=jnp.int32)

    loss = jax.jit(skipgram_forward)(
        input_weight, output_weight, pos_input, pos_output, neg_v)
    loss = jax.block_until_ready(loss)

    ref = skipgram_forward_ref(
        input_weight, output_weight, pos_input, pos_output, neg_v)
    assert jnp.allclose(loss, ref, rtol=1e-5, atol=1e-5), (loss, ref)

    print("KERNEL_OK")
</pallas_src>

<mosaic_0001>
module attributes {stable_mosaic.version = 11 : i64} {
  func.func @kernel(%arg0: i32, %arg1: memref<32x1xi32, #tpu.memory_space<vmem>>, %arg2: memref<1x256xi32, #tpu.memory_space<vmem>>, %arg3: memref<1x32xf32, #tpu.memory_space<vmem>>, %arg4: memref<32x256xf32, #tpu.memory_space<vmem>>, %arg5: memref<64x32xf32, #tpu.memory_space<vmem>>, %arg6: memref<32x64xf32, #tpu.memory_space<vmem>>, %arg7: memref<1x1xf32, #tpu.memory_space<vmem>>) attributes {dimension_semantics = [#tpu.dimension_semantics<arbitrary>], iteration_bounds = array<i64: 1>, scalar_prefetch = 0 : i64, scratch_operands = 0 : i64, tpu.core_type = #tpu.core_type<tc>, window_params = [{pipeline_mode = #tpu.pipeline_mode<synchronous>, transform_indices = @transform_0, window_bounds = array<i64: 32, 1>}, {pipeline_mode = #tpu.pipeline_mode<synchronous>, transform_indices = @transform_1, window_bounds = array<i64: 1, 256>}, {pipeline_mode = #tpu.pipeline_mode<synchronous>, transform_indices = @transform_2, window_bounds = array<i64: 1, 32>}, {pipeline_mode = #tpu.pipeline_mode<synchronous>, transform_indices = @transform_3, window_bounds = array<i64: 32, 256>}, {pipeline_mode = #tpu.pipeline_mode<synchronous>, transform_indices = @transform_4, window_bounds = array<i64: 64, 32>}, {pipeline_mode = #tpu.pipeline_mode<synchronous>, transform_indices = @transform_5, window_bounds = array<i64: 32, 64>}, {pipeline_mode = #tpu.pipeline_mode<synchronous>, transform_indices = @transform_6, window_bounds = array<i64: 1, 1>}]} {
    %0 = tpu.iota {dimensions = array<i32: 1>} : vector<32x64xi32>
    %c0 = arith.constant 0 : index
    %c0_0 = arith.constant 0 : index
    %1 = vector.load %arg1[%c0, %c0_0] : memref<32x1xi32, #tpu.memory_space<vmem>>, vector<32x1xi32>
    %2 = vector.broadcast %1 : vector<32x1xi32> to vector<32x64xi32>
    %3 = arith.cmpi eq, %0, %2 : vector<32x64xi32>
    %cst = arith.constant 1.000000e+00 : f32
    %cst_1 = arith.constant 0.000000e+00 : f32
    %4 = vector.broadcast %cst : f32 to vector<32x64xf32>
    %5 = vector.broadcast %cst_1 : f32 to vector<32x64xf32>
    %6 = arith.select %3, %4, %5 : vector<32x64xi1>, vector<32x64xf32>
    %c0_2 = arith.constant 0 : index
    %c0_3 = arith.constant 0 : index
    %7 = vector.load %arg5[%c0_2, %c0_3] : memref<64x32xf32, #tpu.memory_space<vmem>>, vector<64x32xf32>
    %cst_4 = arith.constant dense<0.000000e+00> : vector<32x32xf32>
    %8 = tpu.matmul %6, %7, %cst_4 {dimension_numbers = #tpu.dot_dimension_numbers<[1], [0], [0], [1], [0, 0, 1, 1], [], []>} : vector<32x64xf32>, vector<64x32xf32>, vector<32x32xf32> -> vector<32x32xf32>
    %9 = tpu.iota {dimensions = array<i32: 0>} : vector<64x256xi32>
    %c0_5 = arith.constant 0 : index
    %c0_6 = arith.constant 0 : index
    %10 = vector.load %arg2[%c0_5, %c0_6] : memref<1x256xi32, #tpu.memory_space<vmem>>, vector<1x256xi32>
    %11 = vector.broadcast %10 : vector<1x256xi32> to vector<64x256xi32>
    %12 = arith.cmpi eq, %9, %11 : vector<64x256xi32>
    %cst_7 = arith.constant 1.000000e+00 : f32
    %cst_8 = arith.constant 0.000000e+00 : f32
    %13 = vector.broadcast %cst_7 : f32 to vector<64x256xf32>
    %14 = vector.broadcast %cst_8 : f32 to vector<64x256xf32>
    %15 = arith.select %12, %13, %14 : vector<64x256xi1>, vector<64x256xf32>
    %c0_9 = arith.constant 0 : index
    %c0_10 = arith.constant 0 : index
    %16 = vector.load %arg6[%c0_9, %c0_10] : memref<32x64xf32, #tpu.memory_space<vmem>>, vector<32x64xf32>
    %cst_11 = arith.constant dense<0.000000e+00> : vector<32x256xf32>
    %17 = tpu.matmul %16, %15, %cst_11 {dimension_numbers = #tpu.dot_dimension_numbers<[1], [0], [0], [1], [0, 0, 1, 1], [], []>} : vector<32x64xf32>, vector<64x256xf32>, vector<32x256xf32> -> vector<32x256xf32>
    %c0_12 = arith.constant 0 : index
    %c0_13 = arith.constant 0 : index
    %18 = vector.load %arg3[%c0_12, %c0_13] : memref<1x32xf32, #tpu.memory_space<vmem>>, vector<1x32xf32>
    %19 = vector.broadcast %18 : vector<1x32xf32> to vector<32x32xf32>
    %20 = arith.mulf %8, %19 : vector<32x32xf32>
    %cst_14 = arith.constant dense<0.000000e+00> : vector<32xf32>
    %21 = vector.multi_reduction <add>, %20, %cst_14 [1] : vector<32x32xf32> to vector<32xf32>
    %22 = vector.shape_cast %21 : vector<32xf32> to vector<32x1xf32>
    %cst_15 = arith.constant 0.000000e+00 : f32
    %23 = vector.broadcast %cst_15 : f32 to vector<32x1xf32>
    %24 = arith.minimumf %22, %23 : vector<32x1xf32>
    %25 = math.absf %22 : vector<32x1xf32>
    %cst_16 = arith.constant 0.000000e+00 : f32
    %26 = vector.broadcast %cst_16 : f32 to vector<32x1xf32>
    %27 = arith.subf %26, %25 : vector<32x1xf32>
    %28 = math.exp %27 : vector<32x1xf32>
    %cst_17 = arith.constant 1.000000e+00 : f32
    %29 = vector.broadcast %cst_17 : f32 to vector<32x1xf32>
    %30 = arith.addf %29, %28 : vector<32x1xf32>
    %31 = math.log %30 : vector<32x1xf32>
    %32 = arith.subf %24, %31 : vector<32x1xf32>
    %cst_18 = arith.constant 0.000000e+00 : f32
    %33 = vector.broadcast %cst_18 : f32 to vector<32x1xf32>
    %34 = arith.subf %33, %32 : vector<32x1xf32>
    %cst_19 = arith.constant dense<0.000000e+00> : vector<32x256xf32>
    %35 = tpu.matmul %8, %17, %cst_19 {dimension_numbers = #tpu.dot_dimension_numbers<[1], [0], [0], [1], [0, 0, 1, 1], [], []>} : vector<32x32xf32>, vector<32x256xf32>, vector<32x256xf32> -> vector<32x256xf32>
    %cst_20 = arith.constant -1.000000e+01 : f32
    %cst_21 = arith.constant 1.000000e+01 : f32
    %36 = vector.broadcast %cst_20 : f32 to vector<32x256xf32>
    %37 = arith.maximumf %36, %35 : vector<32x256xf32>
    %38 = vector.broadcast %cst_21 : f32 to vector<32x256xf32>
    %39 = arith.minimumf %38, %37 : vector<32x256xf32>
    %cst_22 = arith.constant 0.000000e+00 : f32
    %40 = vector.broadcast %cst_22 : f32 to vector<32x256xf32>
    %41 = arith.subf %40, %39 : vector<32x256xf32>
    %cst_23 = arith.constant 0.000000e+00 : f32
    %42 = vector.broadcast %cst_23 : f32 to vector<32x256xf32>
    %43 = arith.minimumf %41, %42 : vector<32x256xf32>
    %44 = math.absf %41 : vector<32x256xf32>
    %cst_24 = arith.constant 0.000000e+00 : f32
    %45 = vector.broadcast %cst_24 : f32 to vector<32x256xf32>
    %46 = arith.subf %45, %44 : vector<32x256xf32>
    %47 = math.exp %46 : vector<32x256xf32>
    %cst_25 = arith.constant 1.000000e+00 : f32
    %48 = vector.broadcast %cst_25 : f32 to vector<32x256xf32>
    %49 = arith.addf %48, %47 : vector<32x256xf32>
    %50 = math.log %49 : vector<32x256xf32>
    %51 = arith.subf %43, %50 : vector<32x256xf32>
    %c0_26 = arith.constant 0 : index
    %c0_27 = arith.constant 0 : index
    %52 = vector.load %arg4[%c0_26, %c0_27] : memref<32x256xf32, #tpu.memory_space<vmem>>, vector<32x256xf32>
    %53 = arith.mulf %52, %51 : vector<32x256xf32>
    %cst_28 = arith.constant dense<0.000000e+00> : vector<32xf32>
    %54 = vector.multi_reduction <add>, %53, %cst_28 [1] : vector<32x256xf32> to vector<32xf32>
    %55 = vector.shape_cast %54 : vector<32xf32> to vector<32x1xf32>
    %cst_29 = arith.constant 0.000000e+00 : f32
    %56 = vector.broadcast %cst_29 : f32 to vector<32x1xf32>
    %57 = arith.minimumf %55, %56 : vector<32x1xf32>
    %58 = math.absf %55 : vector<32x1xf32>
    %cst_30 = arith.constant 0.000000e+00 : f32
    %59 = vector.broadcast %cst_30 : f32 to vector<32x1xf32>
    %60 = arith.subf %59, %58 : vector<32x1xf32>
    %61 = math.exp %60 : vector<32x1xf32>
    %cst_31 = arith.constant 1.000000e+00 : f32
    %62 = vector.broadcast %cst_31 : f32 to vector<32x1xf32>
    %63 = arith.addf %62, %61 : vector<32x1xf32>
    %64 = math.log %63 : vector<32x1xf32>
    %65 = arith.subf %57, %64 : vector<32x1xf32>
    %cst_32 = arith.constant 0.000000e+00 : f32
    %66 = vector.broadcast %cst_32 : f32 to vector<32x1xf32>
    %67 = arith.subf %66, %65 : vector<32x1xf32>
    %68 = arith.addf %34, %67 : vector<32x1xf32>
    %cst_33 = arith.constant dense<0.000000e+00> : vector<1xf32>
    %69 = vector.multi_reduction <add>, %68, %cst_33 [0] : vector<32x1xf32> to vector<1xf32>
    %70 = vector.shape_cast %69 : vector<1xf32> to vector<1x1xf32>
    %cst_34 = arith.constant 3.125000e-02 : f32
    %71 = vector.broadcast %cst_34 : f32 to vector<1x1xf32>
    %72 = arith.mulf %70, %71 : vector<1x1xf32>
    %c0_35 = arith.constant 0 : index
    %c0_36 = arith.constant 0 : index
    %73 = vector.load %arg7[%c0_35, %c0_36] : memref<1x1xf32, #tpu.memory_space<vmem>>, vector<1x1xf32>
    tpu.vector_store %arg7[%c0_35, %c0_36], %72 {strides = array<i32>} : memref<1x1xf32, #tpu.memory_space<vmem>>, vector<1x1xf32>,
    return
  }
  func.func @transform_0(%arg0: i32) -> (i32, i32) {
    %c0_i32 = arith.constant 0 : i32
    %c0_i32_0 = arith.constant 0 : i32
    %c0_i32_1 = arith.constant 0 : i32
    return %c0_i32, %c0_i32_0 : i32, i32
  }
  func.func @transform_1(%arg0: i32) -> (i32, i32) {
    %c0_i32 = arith.constant 0 : i32
    %c0_i32_0 = arith.constant 0 : i32
    %c0_i32_1 = arith.constant 0 : i32
    return %c0_i32, %c0_i32_0 : i32, i32
  }
  func.func @transform_2(%arg0: i32) -> (i32, i32) {
    %c0_i32 = arith.constant 0 : i32
    %c0_i32_0 = arith.constant 0 : i32
    %c0_i32_1 = arith.constant 0 : i32
    return %c0_i32, %c0_i32_0 : i32, i32
  }
  func.func @transform_3(%arg0: i32) -> (i32, i32) {
    %c0_i32 = arith.constant 0 : i32
    %c0_i32_0 = arith.constant 0 : i32
    %c0_i32_1 = arith.constant 0 : i32
    return %c0_i32, %c0_i32_0 : i32, i32
  }
  func.func @transform_4(%arg0: i32) -> (i32, i32) {
    %c0_i32 = arith.constant 0 : i32
    %c0_i32_0 = arith.constant 0 : i32
    %c0_i32_1 = arith.constant 0 : i32
    return %c0_i32, %c0_i32_0 : i32, i32
  }
  func.func @transform_5(%arg0: i32) -> (i32, i32) {
    %c0_i32 = arith.constant 0 : i32
    %c0_i32_0 = arith.constant 0 : i32
    %c0_i32_1 = arith.constant 0 : i32
    return %c0_i32, %c0_i32_0 : i32, i32
  }
  func.func @transform_6(%arg0: i32) -> (i32, i32) {
    %c0_i32 = arith.constant 0 : i32
    %c0_i32_0 = arith.constant 0 : i32
    %c0_i32_1 = arith.constant 0 : i32
    return %c0_i32, %c0_i32_0 : i32, i32
  }
}

</mosaic_0001>

<bundles_post_ra>
// kernel: skipgram_forward.1
= control target key start
LH: loop header
LB: loop body
LE: loop exit
PB: predicated region body
PF: predicated region fallthrough
CT: control target
= control target key end

     0   :  { %v24_v2 = vlaneseq  ;;  %v879_v3 = vmov 0   ;;  %v880_v8 = vmov 0.0   ;;  %s1099_s0 = inlined_call_operand.vmem [shape: s32[32,1], index: 0, kind: input, shape index: {}]   ;;  %s1100_s1 = inlined_call_operand.vmem [shape: s32[1,256], index: 1, kind: input, shape index: {}]   ;;  %s1101_s2 = inlined_call_operand.vmem [shape: f32[1,32], index: 2, kind: input, shape index: {}]   ;;  %s1102_s3 = inlined_call_operand.vmem [shape: f32[32,256], index: 3, kind: input, shape index: {}]   ;;  %s1103_s4 = inlined_call_operand.vmem [shape: f32[64,32], index: 4, kind: input, shape index: {}]   ;;  %s1104_s5 = inlined_call_operand.vmem [shape: f32[32,64], index: 5, kind: input, shape index: {}]   ;;  %s1105_s6 = inlined_call_operand.hbm [shape: f32[1,1], index: 6, kind: output, shape index: {}]  }
   0x1   :  { %v26_v0 = vld [vmem:[%s1099_s0] sm:$0xff]  ;;  %v28_v1 = vld [vmem:[%s1099_s0 + $0x10] sm:$0xff]  ;;  %789 = vset.pattern.permute.xlu0 %v879_v3  ;;  %790 = vset.pattern.permute.xlu1 %v879_v3  ;;  %v27_v4 = vld [vmem:[%s1099_s0 + $0x8] sm:$0xff] }
   0x2   :  { %31 = vperm.xlu0 %789, %v26_v0   ;;  %37 = vperm.xlu1 %790, %v28_v1   ;;  %v29_v5 = vld [vmem:[%s1099_s0 + $0x18] sm:$0xff]  ;;  %v157_v6 = vshrl.u32 %v24_v2, 7  ;;  %v165_v7 = vld [vmem:[%s1100_s1] sm:$0x3]  ;;  %v51_v10 = vld [vmem:[%s1103_s4 + $0x8] sm:$0xff] }
   0x3   :  { %286 = vmatprep.mubr.f32.mxu1 %v880_v8  ;;  %v50_v9 = vld [vmem:[%s1103_s4] sm:$0xff]  ;;  %v52_v14 = vld [vmem:[%s1103_s4 + $0x10] sm:$0xff]  ;;  %v53_v15 = vld [vmem:[%s1103_s4 + $0x18] sm:$0xff] }
   0x4   :  { %v158_v11 = vadd.s32 8, %v157_v6  ;;  %v172_v12 = vsub.s32 1, %v157_v6  ;;  %v168_v13 = vsub.s32 0, %v157_v6  ;;  %v159_v16 = vadd.s32 16, %v157_v6 }
   0x5   :  { %v160_v17 = vadd.s32 24, %v157_v6  ;;  %v161_v18 = vadd.s32 32, %v157_v6  ;;  %v162_v21 = vadd.s32 40, %v157_v6  ;;  %v741_v22 = vpack.c.bf16 %v51_v10, %v50_v9 }
   0x6   :  { %34 = vperm.xlu0 %789, %v27_v4   ;;  %40 = vperm.xlu1 %790, %v29_v5   ;;  %v173_v19 = vrot.slane %v165_v7, %v172_v12  ;;  %v169_v20 = vrot.slane %v165_v7, %v168_v13 }
   0x7   :  { %11 = vsyncpa [#allocation3], 0  ;;  %v163_v23 = vadd.s32 48, %v157_v6  ;;  %v745_v24 = vpack.c.bf16 %v53_v15, %v52_v14  ;;  %v54_v25 = vld [vmem:[%s1103_s4 + $0x20] sm:$0xff]  ;;  %v55_v26 = vld [vmem:[%s1103_s4 + $0x28] sm:$0xff]  ;;  %742 = vmatprep.subr.bf16.mxu0 %v741_v22  ;;  %v164_v28 = vadd.s32 56, %v157_v6 }
   0x8   :  { %vm175_vm0 = vcmp.eq.s32.totalorder %v157_v6, %v173_v19  ;;  %vm177_vm1 = vcmp.eq.s32.totalorder %v158_v11, %v173_v19  ;;  %vm174_vm2 = vcmp.eq.s32.totalorder %v157_v6, %v169_v20  ;;  %vm176_vm3 = vcmp.eq.s32.totalorder %v158_v11, %v169_v20  ;;  %744 = vmatpush3.bf16.msra.mxu0 %v741_v22  ;;  %v56_v30 = vld [vmem:[%s1103_s4 + $0x30] sm:$0xff]  ;;  %v57_v31 = vld [vmem:[%s1103_s4 + $0x38] sm:$0xff]  ;;  %v206_v33 = vld [vmem:[%s1104_s5] sm:$0xff] }
   0x9   :  { %vm757_vm4 = vmpackc.low %vm177_vm1, %vm175_vm0  ;;  %vm179_vm5 = vcmp.eq.s32.totalorder %v159_v16, %v173_v19  ;;  %vm181_vm6 = vcmp.eq.s32.totalorder %v160_v17, %v173_v19  ;;  %vm178_vm7 = vcmp.eq.s32.totalorder %v159_v16, %v169_v20  ;;  %vm180_vm8 = vcmp.eq.s32.totalorder %v160_v17, %v169_v20  ;;  %746 = vmatprep.subr.bf16.mxu0 %v745_v24  ;;  %v207_v34 = vld [vmem:[%s1104_s5 + $0x8] sm:$0xff]  ;;  %v208_v35 = vld [vmem:[%s1104_s5 + $0x10] sm:$0xff] }
   0xa   :  { %v881_v27 = vmov 1.0|1.0   ;;  %vm759_vm9 = vmpackc.low %vm176_vm3, %vm174_vm2  ;;  %vm183_vm10 = vcmp.eq.s32.totalorder %v161_v18, %v173_v19  ;;  %vm185_vm11 = vcmp.eq.s32.totalorder %v162_v21, %v173_v19  ;;  %v749_v29 = vpack.c.bf16 %v55_v26, %v54_v25  ;;  %v209_v36 = vld [vmem:[%s1104_s5 + $0x18] sm:$0xff]  ;;  %v694_v58 = vld [vmem:[%s1101_s2] ss:$0 sm:$0xff] }
   0xb   :  { %758 = vmatprep.subr.msk.bf16.mxu1 %vm757_vm4, %v881_v27  ;;  %vm761_vm12 = vmpackc.low %vm181_vm6, %vm179_vm5  ;;  %vm182_vm15 = vcmp.eq.s32.totalorder %v161_v18, %v169_v20  ;;  %vm184_vm0 = vcmp.eq.s32.totalorder %v162_v21, %v169_v20  ;;  %vm187_vm1 = vcmp.eq.s32.totalorder %v163_v23, %v173_v19  ;;  %vm189_vm2 = vcmp.eq.s32.totalorder %v164_v28, %v173_v19 }
   0xc   :  { %760 = vmatpush1.bf16.msk.msra.mxu1 %vm759_vm9, %v881_v27  ;;  %vm763_vm13 = vmpackc.low %vm180_vm8, %vm178_vm7  ;;  %748 = vmatpush3.bf16.msra.mxu0 %v745_v24  ;;  %v753_v32 = vpack.c.bf16 %v57_v31, %v56_v30  ;;  %vm186_vm5 = vcmp.eq.s32.totalorder %v163_v23, %v169_v20  ;;  %vm188_vm6 = vcmp.eq.s32.totalorder %v164_v28, %v169_v20  ;;  %vm58_vm8 = vcmask 523264  }
   0xd   :  { %762 = vmatprep.subr.msk.bf16.mxu1 %vm761_vm12, %v881_v27  ;;  %vm765_vm14 = vmpackc.low %vm185_vm11, %vm183_vm10  ;;  %750 = vmatprep.subr.bf16.mxu0 %v749_v29  ;;  %v25_v37 = vand.u32 127, %v24_v2 }
   0xe   :  { %vm767_vm3 = vmpackc.low %vm184_vm0, %vm182_vm15 }
   0xf   :  { %vm769_vm4 = vmpackc.low %vm189_vm2, %vm187_vm1 }
  0x10   :  { %764 = vmatpush1.bf16.msk.msra.mxu1 %vm763_vm13, %v881_v27  ;;  %752 = vmatpush3.bf16.msra.mxu0 %v749_v29  ;;  %vm771_vm7 = vmpackc.low %vm188_vm6, %vm186_vm5  ;;  %vm322_vm13 = vcmask 261120  }
  0x11   :  { %766 = vmatprep.subr.msk.bf16.mxu1 %vm765_vm14, %v881_v27  ;;  %754 = vmatprep.subr.bf16.mxu0 %v753_v32  ;;  %vm654_vm14 = vcmask 0  }
  0x14   :  { %768 = vmatpush1.bf16.msk.msra.mxu1 %vm767_vm3, %v881_v27  ;;  %756 = vmatpush3.bf16.msra.mxu0 %v753_v32 }
  0x15   :  { %770 = vmatprep.subr.msk.bf16.mxu1 %vm769_vm4, %v881_v27 }
  0x18   :  { %772 = vmatpush1.bf16.msk.msra.mxu1 %vm771_vm7, %v881_v27 }
  0x1b   :  { %690 = vmatmul.mubr.msk.f32.vlgmr.msra.gmra.mrb[0].mxu1 %vm58_vm8, %v206_v33 }
  0x1c   :  { %292 = vmatprep.mubr.f32.mxu1 %v880_v8 }
  0x1f   :  { %691 = vmatmul.mubr.msk.f32.gmra.mrb[2].mxu1 %vm58_vm8, %v207_v34 }
  0x20   :  { %298 = vmatprep.mubr.f32.mxu1 %v880_v8 }
  0x23   :  { %692 = vmatmul.mubr.msk.f32.gmra.mrb[4].mxu1 %vm58_vm8, %v208_v35 }
  0x24   :  { %304 = vmatprep.mubr.f32.mxu1 %v880_v8 }
  0x27   :  { %693 = vmatmul.mubr.msk.f32.gmra.mrb[6].mxu1 %vm58_vm8, %v209_v36 }
  0x28   :  { %469 = vmatprep.mubr.f32.mxu1 %v880_v8 }
  0x81   :  { %v32_v38 = vpop.permute.xlu0 %31  ;;  %v38_v39 = vpop.permute.xlu1 %37 }
  0x82   :  { %vm42_vm9 = vcmp.eq.s32.totalorder %v25_v37, %v32_v38  ;;  %vm44_vm10 = vcmp.eq.s32.totalorder %v25_v37, %v38_v39 }
  0x83   :  { %v46_v40 = vsel %vm42_vm9, 1.0, %v880_v8  ;;  %v48_v43 = vsel %vm44_vm10, 1.0, %v880_v8 }
  0x84   :  { %735 = vmatprep.mubr.msk.f32.mxu0 %vm58_vm8, %v46_v40 }
  0x85   :  { %v35_v41 = vpop.permute.xlu0 %34  ;;  %v41_v42 = vpop.permute.xlu1 %40 }
  0x86   :  { %vm43_vm11 = vcmp.eq.s32.totalorder %v25_v37, %v35_v41  ;;  %vm45_vm12 = vcmp.eq.s32.totalorder %v25_v37, %v41_v42 }
  0x87   :  { %v47_v44 = vsel %vm43_vm11, 1.0, %v880_v8  ;;  %v49_v45 = vsel %vm45_vm12, 1.0, %v880_v8 }
  0x88   :  { %736 = vmatmul.mubr.msk.f32.vlgmr.msra.gmra.mrb[0].mxu0 %vm58_vm8, %v47_v44 }
  0x89   :  { %738 = vmatprep.mubr.msk.f32.mxu0 %vm58_vm8, %v48_v43 }
  0x8c   :  { %739 = vmatmul.mubr.msk.f32.gmra.mrb[2].mxu0 %vm58_vm8, %v49_v45 }
  0x8d   :  { %451 = vmatprep.mubr.f32.mxu0 %v880_v8 }
  0xee   :  { %v288_v46 = vpop.f32.mrb[0].mxu1 }
  0xef   :  { %v290_v47 = vpop.f32.mrb[1].mxu1 }
  0xf2   :  { %v294_v48 = vpop.f32.mrb[2].mxu1 }
  0xf3   :  { %v775_v49 = vpack.c.bf16 %v294_v48, %v288_v46  ;;  %v296_v50 = vpop.f32.mrb[3].mxu1 }
  0xf4   :  { %v773_v51 = vpack.c.bf16 %v296_v50, %v290_v47 }
  0xf6   :  { %774 = vmatprep.subr.bf16.mxu0 %v773_v51  ;;  %781 = vmatprep.subr.bf16.mxu1 %v773_v51  ;;  %v300_v52 = vpop.f32.mrb[4].mxu1 }
  0xf7   :  { %776 = vmatpush1.bf16.msra.mxu0 %v775_v49  ;;  %783 = vmatpush1.bf16.msra.mxu1 %v775_v49  ;;  %v302_v53 = vpop.f32.mrb[5].mxu1 }
  0xfa   :  { %v306_v54 = vpop.f32.mrb[6].mxu1 }
  0xfb   :  { %v779_v55 = vpack.c.bf16 %v306_v54, %v300_v52  ;;  %v308_v56 = vpop.f32.mrb[7].mxu1 }
  0xfc   :  { %v777_v57 = vpack.c.bf16 %v308_v56, %v302_v53 }
  0xfe   :  { %778 = vmatprep.subr.bf16.mxu0 %v777_v57  ;;  %782 = vmatprep.subr.bf16.mxu1 %v777_v57 }
  0xff   :  { %780 = vmatpush1.bf16.msra.mxu0 %v779_v55  ;;  %784 = vmatpush1.bf16.msra.mxu1 %v779_v55 }
 0x15b   :  { %v737_v59 = vpop.f32.mrb[0].mxu0 }
 0x15c   :  { %v319_v60 = vmul.f32 %v737_v59, %v694_v58  ;;  %v137_v61 = vpop.f32.mrb[1].mxu0 }
 0x15d   :  { %v318_v62 = vmul.f32 %v694_v58, %v137_v61  ;;  %695 = vmatmul.mubr.msk.f32.vlgmr.msra.gmra.mrb[4].mxu0 %vm322_vm13, %v137_v61 }
 0x15e   :  { %v326_v63 = vsel %vm322_vm13, %v319_v60, 0.0  ;;  %457 = vmatprep.mubr.f32.mxu0 %v880_v8 }
 0x15f   :  { %327 = vadd.xlane.f32.xlu1 %v326_v63  ;;  %v740_v0 = vpop.f32.mrb[2].mxu0  ;;  %v323_v1 = vsel %vm322_vm13, %v318_v62, 0.0 }
 0x160   :  { %324 = vadd.xlane.f32.xlu0 %v323_v1  ;;  %v147_v2 = vpop.f32.mrb[3].mxu0  ;;  %698 = vmatmul.mubr.msk.f32.vlgmr.msra.gmra.mrb[8].mxu1 %vm322_vm13, %v740_v0  ;;  %v321_v4 = vmul.f32 %v740_v0, %v694_v58 }
 0x161   :  { %v320_v3 = vmul.f32 %v694_v58, %v147_v2  ;;  %696 = vmatmul.mubr.msk.f32.gmra.mrb[6].mxu0 %vm322_vm13, %v737_v59 }
 0x162   :  { %463 = vmatprep.mubr.f32.mxu0 %v880_v8  ;;  %v332_v6 = vsel %vm322_vm13, %v321_v4, 0.0 }
 0x163   :  { %v329_v5 = vsel %vm322_vm13, %v320_v3, 0.0 }
 0x164   :  { %330 = vadd.xlane.f32.xlu1 %v329_v5 }
 0x165   :  { %697 = vmatmul.mubr.msk.f32.gmra.mrb[8].mxu0 %vm322_vm13, %v147_v2 }
 0x168   :  { %333 = vadd.xlane.f32.xlu1 %v332_v6 }
 0x230   :  { %v453_v7 = vpop.f32.mrb[4].mxu0 }
 0x231   :  { %v699_v9 = vclamps-f32 %v453_v7, 10.0  ;;  %v455_v10 = vpop.f32.mrb[5].mxu0 }
 0x232   :  { %v700_v11 = vclamps-f32 %v455_v10, 10.0 }
 0x233   :  { %v1003_v12 = vsub.f32 0.0, %v699_v9  ;;  %v471_v13 = vpop.f32.mrb[8].mxu1 }
 0x234   :  { %v1005_v14 = vsub.f32 0.0, %v700_v11  ;;  %v705_v15 = vclamps-f32 %v471_v13, 10.0  ;;  %v459_v8 = vpop.f32.mrb[6].mxu0  ;;  %v473_v16 = vpop.f32.mrb[9].mxu1 }
 0x235   :  { %v508_v17 = vand.u32 2147483647, %v1003_v12  ;;  %v701_v18 = vclamps-f32 %v459_v8, 10.0  ;;  %v706_v19 = vclamps-f32 %v473_v16, 10.0  ;;  %v461_v20 = vpop.f32.mrb[7].mxu0  ;;  %v500_v10 = vmin.f32 %v1003_v12, 0.0 }
 0x236   :  { %v509_v21 = vand.u32 2147483647, %v1005_v14  ;;  %v1009_v22 = vsub.f32 0.0, %v705_v15  ;;  %v702_v23 = vclamps-f32 %v461_v20, 10.0  ;;  %v501_v13 = vmin.f32 %v1005_v14, 0.0  ;;  %v572_v8 = vld [vmem:[%s1102_s3] sm:$0xff] }
 0x237   :  { %v516_v24 = vsub.f32 0.0, %v508_v17  ;;  %v1011_v25 = vsub.f32 0.0, %v701_v18  ;;  %v1013_v26 = vsub.f32 0.0, %v706_v19  ;;  %v573_v18 = vld [vmem:[%s1102_s3 + $0x8] sm:$0xff] }
 0x238   :  { %v517_v27 = vsub.f32 0.0, %v509_v21  ;;  %v514_v28 = vand.u32 2147483647, %v1009_v22  ;;  %v1016_v29 = vsub.f32 0.0, %v702_v23  ;;  %v465_v30 = vpop.f32.mrb[8].mxu0  ;;  %v506_v21 = vmin.f32 %v1009_v22, 0.0 }
 0x239   :  { %v524_v31 = vmul.f32 1.442695, %v516_v24  ;;  %v510_v32 = vand.u32 2147483647, %v1011_v25  ;;  %v515_v35 = vand.u32 2147483647, %v1013_v26 }
 0x23a   :  { %v526_v33 = vmul.f32 1.442695, %v517_v27  ;;  %v522_v34 = vsub.f32 0.0, %v514_v28  ;;  %v511_v37 = vand.u32 2147483647, %v1016_v29  ;;  %v703_v38 = vclamps-f32 %v465_v30, 10.0 }
 0x23b   :  { %791 = vpow2.f32 %v524_v31  ;;  %v518_v36 = vsub.f32 0.0, %v510_v32  ;;  %v467_v39 = vpop.f32.mrb[9].mxu0  ;;  %v523_v41 = vsub.f32 0.0, %v515_v35  ;;  %v502_v24 = vmin.f32 %v1011_v25, 0.0  ;;  %v578_v28 = vld [vmem:[%s1102_s3 + $0x30] sm:$0xff] }
 0x23c   :  { %793 = vpow2.f32 %v526_v33  ;;  %v536_v40 = vmul.f32 1.442695, %v522_v34  ;;  %v704_v42 = vclamps-f32 %v467_v39, 10.0  ;;  %v519_v44 = vsub.f32 0.0, %v511_v37  ;;  %v574_v22 = vld [vmem:[%s1102_s3 + $0x10] sm:$0xff]  ;;  %v579_v37 = vld [vmem:[%s1102_s3 + $0x38] sm:$0xff] }
 0x23d   :  { %v528_v43 = vmul.f32 1.442695, %v518_v36  ;;  %v1021_v45 = vsub.f32 0.0, %v703_v38  ;;  %v538_v46 = vmul.f32 1.442695, %v523_v41  ;;  %v507_v32 = vmin.f32 %v1013_v26, 0.0 }
 0x23e   :  { %795 = vpow2.f32 %v536_v40  ;;  %v1023_v47 = vsub.f32 0.0, %v704_v42  ;;  %v530_v48 = vmul.f32 1.442695, %v519_v44  ;;  %v503_v36 = vmin.f32 %v1016_v29, 0.0  ;;  %v575_v26 = vld [vmem:[%s1102_s3 + $0x18] sm:$0xff] }
 0x23f   :  { %797 = vpow2.f32 %v528_v43  ;;  %v512_v49 = vand.u32 2147483647, %v1021_v45  ;;  %v504_v29 = vmin.f32 %v1021_v45, 0.0 }
 0x240   :  { %799 = vpow2.f32 %v538_v46  ;;  %v513_v50 = vand.u32 2147483647, %v1023_v47 }
 0x241   :  { %801 = vpow2.f32 %v530_v48  ;;  %v520_v51 = vsub.f32 0.0, %v512_v49 }
 0x242   :  { %v521_v52 = vsub.f32 0.0, %v513_v50  ;;  %v505_v50 = vmin.f32 %v1023_v47, 0.0  ;;  %v1059_v47 = vpop.xlane.xlu1 %327 }
 0x243   :  { %v532_v53 = vmul.f32 1.442695, %v520_v51 }
 0x244   :  { %v534_v54 = vmul.f32 1.442695, %v521_v52  ;;  %v576_v52 = vld [vmem:[%s1102_s3 + $0x20] sm:$0xff] }
 0x245   :  { %v792_v55 = vpop.eup %791  ;;  %803 = vpow2.f32 %v532_v53 }
 0x246   :  { %v794_v56 = vpop.eup %793  ;;  %v540_v57 = vadd.f32 1.0, %v792_v55  ;;  %805 = vpow2.f32 %v534_v54 }
 0x247   :  { %v541_v58 = vadd.f32 1.0, %v794_v56  ;;  %v577_v56 = vld [vmem:[%s1102_s3 + $0x28] sm:$0xff]  ;;  %s882_s3 = smov [#allocation2]  }
 0x248   :  { %v796_v59 = vpop.eup %795  ;;  %807 = vlog2.f32 %v540_v57  ;;  %s662_s18 = sshll.u32 %s882_s3, 4  ;;  %s663_s18 = int_to_ptr.vmem [resolvable:$true] %s662_s18 }
 0x249   :  { %v798_v60 = vpop.eup %797  ;;  %809 = vlog2.f32 %v541_v58  ;;  %v546_v61 = vadd.f32 1.0, %v796_v59  ;;  %s855_s19 = scalar_lea.vmem %s663_s18, 16  ;;  %s859_s20 = scalar_lea.vmem %s663_s18, 32 }
 0x24a   :  { %v800_v62 = vpop.eup %799  ;;  %v542_v63 = vadd.f32 1.0, %v798_v60  ;;  %v1061_v60 = vpop.xlane.xlu0 %324  ;;  %p856_p0 = scmp.ne.s32.totalorder %s663_s18, %s855_s19  ;;  %p860_p1 = scmp.lt.s32.totalorder %s663_s18, %s663_s18 }
 0x24b   :  { %v802_v0 = vpop.eup %801  ;;  %811 = vlog2.f32 %v546_v61  ;;  %v547_v1 = vadd.f32 1.0, %v800_v62  ;;  %v1063_v61 = vpop.xlane.xlu1 %330  ;;  %v340_v62 = vand.u32 2147483647, %v1059_v47  ;;  %p861_p2 = scmp.lt.s32.totalorder %s859_s20, %s855_s19 }
 0x24c   :  { %813 = vlog2.f32 %v542_v63  ;;  %v543_v2 = vadd.f32 1.0, %v802_v0  ;;  %v339_v63 = vand.u32 2147483647, %v1061_v60 }
 0x24d   :  { %815 = vlog2.f32 %v547_v1  ;;  %v344_v0 = vsub.f32 0.0, %v340_v62  ;;  %v341_v1 = vand.u32 2147483647, %v1063_v61  ;;  %p862_p3 = por %p861_p2, %p860_p1 }
 0x24e   :  { %817 = vlog2.f32 %v543_v2  ;;  %v343_v2 = vsub.f32 0.0, %v339_v63 }
 0x24f   :  { %v804_v3 = vpop.eup %803  ;;  %p863_p4 = pnand %p862_p3, %p856_p0 }
 0x250   :  { %v806_v4 = vpop.eup %805  ;;  %v544_v5 = vadd.f32 1.0, %v804_v3  ;;  %v1068_v3 = vpop.xlane.xlu1 %333 }
 0x251   :  { %v545_v6 = vadd.f32 1.0, %v806_v4  ;;  %v349_v4 = vmul.f32 1.442695, %v344_v0 }
 0x252   :  { %v808_v7 = vpop.eup %807  ;;  %819 = vlog2.f32 %v544_v5  ;;  %v345_v5 = vsub.f32 0.0, %v341_v1 }
 0x253   :  { %v810_v9 = vpop.eup %809  ;;  %v549_v11 = vmul.f32 0.6931472, %v808_v7  ;;  %821 = vlog2.f32 %v545_v6  ;;  %v342_v6 = vand.u32 2147483647, %v1068_v3  ;;  %v347_v7 = vmul.f32 1.442695, %v343_v2 }
 0x254   :  { %v551_v15 = vmul.f32 0.6931472, %v810_v9  ;;  %823 = vpow2.f32 %v349_v4 }
 0x255   :  { %v812_v16 = vpop.eup %811  ;;  %v564_v17 = vsub.f32 %v500_v10, %v549_v11  ;;  %v351_v11 = vmul.f32 1.442695, %v345_v5  ;;  %825 = vpow2.f32 %v347_v7 }
 0x256   :  { %v814_v19 = vpop.eup %813  ;;  %v565_v20 = vsub.f32 %v501_v13, %v551_v15  ;;  %v561_v12 = vmul.f32 0.6931472, %v812_v16  ;;  %v346_v13 = vsub.f32 0.0, %v342_v6 }
 0x257   :  { %v816_v23 = vpop.eup %815  ;;  %v553_v14 = vmul.f32 0.6931472, %v814_v19  ;;  %v580_v27 = vmul.f32 %v572_v8, %v564_v17  ;;  %827 = vpow2.f32 %v351_v11  ;;  %v338_v11 = vmin.f32 %v1068_v3, 0.0 }
 0x258   :  { %v818_v30 = vpop.eup %817  ;;  %v570_v31 = vsub.f32 %v506_v21, %v561_v12  ;;  %v563_v33 = vmul.f32 0.6931472, %v816_v23  ;;  %v581_v34 = vmul.f32 %v573_v18, %v565_v20  ;;  %v353_v17 = vmul.f32 1.442695, %v346_v13 }
 0x259   :  { %v566_v35 = vsub.f32 %v502_v24, %v553_v14  ;;  %v555_v25 = vmul.f32 0.6931472, %v818_v30 }
 0x25a   :  { %v571_v38 = vsub.f32 %v507_v32, %v563_v33  ;;  %v588_v39 = vadd.f32 %v581_v34, %v580_v27  ;;  %v586_v40 = vmul.f32 %v578_v28, %v570_v31 }
 0x25b   :  { %v567_v41 = vsub.f32 %v503_v36, %v555_v25  ;;  %v582_v42 = vmul.f32 %v574_v22, %v566_v35 }
 0x25c   :  { %v820_v43 = vpop.eup %819  ;;  %589 = vadd.xlane.f32.xlu0 %v588_v39  ;;  %v587_v44 = vmul.f32 %v579_v37, %v571_v38 }
 0x25d   :  { %v822_v46 = vpop.eup %821  ;;  %v557_v48 = vmul.f32 0.6931472, %v820_v43  ;;  %v583_v49 = vmul.f32 %v575_v26, %v567_v41 }
 0x25e   :  { %v559_v51 = vmul.f32 0.6931472, %v822_v46  ;;  %v597_v53 = vadd.f32 %v587_v44, %v586_v40  ;;  %v824_v23 = vpop.eup %823 }
 0x25f   :  { %v568_v54 = vsub.f32 %v504_v29, %v557_v48  ;;  %v591_v55 = vadd.f32 %v583_v49, %v582_v42  ;;  %v826_v24 = vpop.eup %825  ;;  %v356_v28 = vadd.f32 1.0, %v824_v23 }
 0x260   :  { %v569_v57 = vsub.f32 %v505_v50, %v559_v51  ;;  %v355_v33 = vadd.f32 1.0, %v826_v24 }
 0x261   :  { %592 = vadd.xlane.f32.xlu0 %v591_v55  ;;  %v584_v58 = vmul.f32 %v576_v52, %v568_v54  ;;  %v828_v32 = vpop.eup %827 }
 0x262   :  { %v585_v45 = vmul.f32 %v577_v56, %v569_v57  ;;  %v357_v36 = vadd.f32 1.0, %v828_v32  ;;  %v336_v57 = vmin.f32 %v1059_v47, 0.0 }
 0x264   :  { %v594_v59 = vadd.f32 %v585_v45, %v584_v58  ;;  %v335_v45 = vmin.f32 %v1061_v60, 0.0 }
 0x266   :  { %595 = vadd.xlane.f32.xlu0 %v594_v59  ;;  %v337_v59 = vmin.f32 %v1063_v61, 0.0 }
 0x26a   :  { %598 = vadd.xlane.f32.xlu0 %v597_v53 }
 0x2e9   :  { %v1071_v9 = vpop.xlane.xlu0 %589 }
 0x2ea   :  { %v604_v10 = vand.u32 2147483647, %v1071_v9  ;;  %v600_v58 = vmin.f32 %v1071_v9, 0.0 }
 0x2ec   :  { %v608_v15 = vsub.f32 0.0, %v604_v10 }
 0x2ee   :  { %v612_v8 = vmul.f32 1.442695, %v608_v15  ;;  %v593_v16 = vpop.xlane.xlu0 %592 }
 0x2ef   :  { %v605_v18 = vand.u32 2147483647, %v593_v16  ;;  %v601_v54 = vmin.f32 %v593_v16, 0.0 }
 0x2f0   :  { %829 = vpow2.f32 %v612_v8 }
 0x2f1   :  { %v609_v19 = vsub.f32 0.0, %v605_v18  ;;  %831 = vpow2.f32 %v353_v17 }
 0x2f3   :  { %v614_v20 = vmul.f32 1.442695, %v609_v19  ;;  %v1074_v21 = vpop.xlane.xlu0 %595 }
 0x2f4   :  { %v606_v12 = vand.u32 2147483647, %v1074_v21  ;;  %v602_v7 = vmin.f32 %v1074_v21, 0.0 }
 0x2f5   :  { %833 = vpow2.f32 %v614_v20 }
 0x2f6   :  { %v610_v14 = vsub.f32 0.0, %v606_v12 }
 0x2f7   :  { %v1077_v27 = vpop.xlane.xlu0 %598 }
 0x2f8   :  { %v616_v30 = vmul.f32 1.442695, %v610_v14  ;;  %v607_v31 = vand.u32 2147483647, %v1077_v27  ;;  %v603_v18 = vmin.f32 %v1077_v27, 0.0 }
 0x2fa   :  { %v830_v34 = vpop.eup %829  ;;  %835 = vpow2.f32 %v616_v30  ;;  %v611_v22 = vsub.f32 0.0, %v607_v31 }
 0x2fb   :  { %v620_v35 = vadd.f32 1.0, %v830_v34  ;;  %837 = vlog2.f32 %v356_v28  ;;  %v832_v37 = vpop.eup %831 }
 0x2fc   :  { %v618_v25 = vmul.f32 1.442695, %v611_v22  ;;  %839 = vlog2.f32 %v355_v33  ;;  %v358_v39 = vadd.f32 1.0, %v832_v37 }
 0x2fe   :  { %841 = vpow2.f32 %v618_v25 }
 0x2ff   :  { %v834_v38 = vpop.eup %833  ;;  %843 = vlog2.f32 %v620_v35 }
 0x300   :  { %845 = vlog2.f32 %v357_v36  ;;  %v621_v26 = vadd.f32 1.0, %v834_v38 }
 0x302   :  { %847 = vlog2.f32 %v621_v26 }
 0x303   :  { %849 = vlog2.f32 %v358_v39 }
 0x304   :  { %v836_v40 = vpop.eup %835 }
 0x305   :  { %v622_v41 = vadd.f32 1.0, %v836_v40  ;;  %v838_v42 = vpop.eup %837 }
 0x306   :  { %v840_v43 = vpop.eup %839  ;;  %v362_v50 = vmul.f32 0.6931472, %v838_v42 }
 0x307   :  { %851 = vlog2.f32 %v622_v41  ;;  %v360_v51 = vmul.f32 0.6931472, %v840_v43 }
 0x308   :  { %v842_v44 = vpop.eup %841  ;;  %v368_v63 = vsub.f32 %v336_v57, %v362_v50 }
 0x309   :  { %v844_v46 = vpop.eup %843  ;;  %v623_v29 = vadd.f32 1.0, %v842_v44  ;;  %v367_v2 = vsub.f32 %v335_v45, %v360_v51 }
 0x30a   :  { %v846_v48 = vpop.eup %845  ;;  %v625_v52 = vmul.f32 0.6931472, %v844_v46  ;;  %v372_v47 = vsub.f32 0.0, %v368_v63 }
 0x30b   :  { %853 = vlog2.f32 %v623_v29  ;;  %v364_v53 = vmul.f32 0.6931472, %v846_v48  ;;  %v371_v60 = vsub.f32 0.0, %v367_v2 }
 0x30c   :  { %v848_v49 = vpop.eup %847  ;;  %v632_v0 = vsub.f32 %v600_v58, %v625_v52 }
 0x30d   :  { %v627_v55 = vmul.f32 0.6931472, %v848_v49  ;;  %v850_v56 = vpop.eup %849  ;;  %v369_v4 = vsub.f32 %v337_v59, %v364_v53 }
 0x30e   :  { %v366_v5 = vmul.f32 0.6931472, %v850_v56  ;;  %v636_v13 = vsub.f32 0.0, %v632_v0 }
 0x30f   :  { %v633_v62 = vsub.f32 %v601_v54, %v627_v55  ;;  %v373_v8 = vsub.f32 0.0, %v369_v4 }
 0x310   :  { %v370_v61 = vsub.f32 %v338_v11, %v366_v5  ;;  %v640_v20 = vadd.f32 %v636_v13, %v371_v60 }
 0x311   :  { %v852_v1 = vpop.eup %851  ;;  %v637_v6 = vsub.f32 0.0, %v633_v62 }
 0x312   :  { %v629_v10 = vmul.f32 0.6931472, %v852_v1  ;;  %v374_v24 = vsub.f32 0.0, %v370_v61 }
 0x313   :  { %v641_v16 = vadd.f32 %v637_v6, %v372_v47 }
 0x314   :  { %v634_v9 = vsub.f32 %v602_v7, %v629_v10 }
 0x315   :  { %v854_v15 = vpop.eup %853  ;;  %v644_v21 = vadd.f32 %v641_v16, %v640_v20 }
 0x316   :  { %v638_v17 = vsub.f32 0.0, %v634_v9  ;;  %v631_v19 = vmul.f32 0.6931472, %v854_v15 }
 0x318   :  { %v642_v12 = vadd.f32 %v638_v17, %v373_v8  ;;  %v635_v23 = vsub.f32 %v603_v18, %v631_v19 }
 0x31a   :  { %v639_v14 = vsub.f32 0.0, %v635_v23  ;;  %v645_v28 = vadd.f32 %v644_v21, %v642_v12 }
 0x31c   :  { %v643_v3 = vadd.f32 %v639_v14, %v374_v24 }
 0x31e   :  { %v646_v30 = vadd.f32 %v645_v28, %v643_v3 }
 0x320   :  { %v647_v31 = vrot.slane %v646_v30, 4 }
 0x322   :  { %v648_v32 = vadd.f32 %v647_v31, %v646_v30 }
 0x324   :  { %v649_v33 = vrot.slane %v648_v32, 2 }
 0x326   :  { %v650_v34 = vadd.f32 %v649_v33, %v648_v32 }
 0x328   :  { %v651_v22 = vrot.slane %v650_v34, 1 }
 0x32a   :  { %v652_v35 = vadd.f32 %v651_v22, %v650_v34 }
 0x32c   :  { %v653_v27 = vmul.f32 0.03125, %v652_v35 }
 0x32e   :  { %655 = vst.msk [vmem:[#allocation2] sm:$0x1] %vm654_vm14, %v653_v27 }
 0x32f   :  { %866 = shalt.err (!%p863_p4)
}
 0x330   :  { %s867_s22 = scalar_lea.hbm %s1105_s6, 16 }
 0x331   :  { %p868_p5 = scmp.ne.s32.totalorder %s1105_s6, %s867_s22  ;;  %p871_p6 = scmp.lt.u32.totalorder %s867_s22, %s1105_s6 }
 0x333   :  { %p873_p7 = pnand %p871_p6, %p868_p5 }
 0x335   :  { %876 = shalt.err (!%p873_p7)
}
 0x336   :  { %665 = dma.vmem_to_hbm [thread:$0]  %s663_s18, 16, %s1105_s6, [#allocation3]  }
 0x337   :  { %877 = dma.done.wait [#allocation3], 16  }
 0x338   :  { %878 = vsyncadd [#allocation3], 4294967280 }
 0x339   :  { %669 = vsyncpa [#allocation3], 1 }

</bundles_post_ra>
